<compile_context>
chip_gen: v7x
topology: tpu7x:2x2x1
jax: 0.10.0
libtpu: 0.0.40
codegen_flags: <defaults>
</compile_context>

<pallas_src>
import functools

import jax
import jax.numpy as jnp
from jax.experimental import pallas as pl
from jax.experimental.pallas import tpu as pltpu


def lstm_chunk_kernel(emb_ref, wih_ref, whh_ref, b_ref, wfc_ref, bfc_ref,
                      out_ref, h_scr, c_scr, gx_scr, *, seq_len, time_chunk):
    """One (batch-tile, time-chunk) grid step of the LSTM recurrence.

    emb_ref : (TC*Bt, E)   bf16  chunk of the embedded sequence, rows ordered
                                 (timestep-major, then batch-within-tile)
    wih_ref : (E, 4H)      bf16  weight_ih_l0.T
    whh_ref : (H, 4H)      bf16  weight_hh_l0.T
    b_ref   : (1, 4H)      f32   bias_ih_l0 + bias_hh_l0
    wfc_ref : (H, Cp)      bf16  fc.weight.T, class dim padded to a full lane
    bfc_ref : (1, Cp)      f32   fc.bias (padded)
    out_ref : (Bt, Cp)     f32   logits for this batch tile (written on last chunk)
    h_scr   : (Bt, H)      f32   hidden state carried across time chunks
    c_scr   : (Bt, H)      f32   cell state carried across time chunks
    gx_scr  : (TC*Bt, 4H)  f32   staged input projection for this chunk
    """
    t_idx = pl.program_id(1)
    Bt, H = h_scr.shape
    TC = time_chunk

    @pl.when(t_idx == 0)
    def _init():
        h_scr[...] = jnp.zeros_like(h_scr)
        c_scr[...] = jnp.zeros_like(c_scr)

    # (1) Hoisted input projection: one (TC*Bt, E) @ (E, 4H) MXU matmul covers
    #     every timestep of this chunk.  Staged into VMEM scratch so only one
    #     (Bt, 4H) slice is live inside the recurrence (bounded vreg pressure).
    gx_scr[...] = (jnp.dot(emb_ref[...], wih_ref[...],
                           preferred_element_type=jnp.float32)
                   + b_ref[...])                          # (TC*Bt, 4H) f32

    whh = whh_ref[...]
    h = h_scr[...]
    c = c_scr[...]

    rem = seq_len % TC        # static; nonzero only if T was padded up to T_pad

    # (2) Recurrence over the chunk, fully unrolled (static trip count).  Only
    #     the small h @ W_hh matmul + EUP/VPU gate math remain per step.
    for s in range(TC):
        gx_s = gx_scr[pl.ds(s * Bt, Bt), :]               # static, sublane-aligned
        g = gx_s + jnp.dot(h.astype(whh.dtype), whh,
                           preferred_element_type=jnp.float32)
        i_g = jax.nn.sigmoid(g[:, 0 * H:1 * H])
        f_g = jax.nn.sigmoid(g[:, 1 * H:2 * H])
        g_g = jnp.tanh(g[:, 2 * H:3 * H])
        o_g = jax.nn.sigmoid(g[:, 3 * H:4 * H])
        c_new = f_g * c + i_g * g_g
        h_new = o_g * jnp.tanh(c_new)
        if rem != 0 and s >= rem:
            # Only statically-possible padded step positions pay for the mask;
            # they are invalid exactly in the final time chunk.
            valid = (t_idx * TC + s) < seq_len
            h = jnp.where(valid, h_new, h)
            c = jnp.where(valid, c_new, c)
        else:
            h, c = h_new, c_new

    h_scr[...] = h
    c_scr[...] = c

    # (3) Final linear layer only on the last chunk; lane-dense (Cp = 128k) store.
    @pl.when(t_idx == pl.num_programs(1) - 1)
    def _final():
        out_ref[...] = (jnp.dot(h.astype(wfc_ref.dtype), wfc_ref[...],
                                preferred_element_type=jnp.float32)
                        + bfc_ref[...])


def _largest_divisor_leq(n, cap):
    best = 1
    for d in range(1, min(n, cap) + 1):
        if n % d == 0:
            best = d
    return best


def _vmem_estimate(batch_tile, time_chunk, E, H, C_pad, mx_bytes=2):
    """Rough VMEM footprint: double-buffered streamed input, scratch, weights."""
    chunk = time_chunk * batch_tile
    emb_buf = 2 * chunk * E * mx_bytes                    # streamed chunk, 2 buffers
    gx_scr = chunk * 4 * H * 4                            # staged projection (f32)
    hc_scr = 2 * batch_tile * H * 4
    weights = 2 * (E * 4 * H + H * 4 * H + H * C_pad) * mx_bytes \
        + 2 * (4 * H + C_pad) * 4
    out_buf = 2 * batch_tile * C_pad * 4
    return emb_buf + gx_scr + hc_scr + weights + out_buf


def skipgram_classifier_forward(input_ids, params, *, time_chunk=None,
                                batch_tile=None, matmul_dtype=jnp.bfloat16):
    """Embedding gather + layout prep (plain JAX), then the Pallas LSTM kernel."""
    emb_table = params["embedding"]                      # (V, E)
    w_ih, w_hh = params["w_ih"], params["w_hh"]          # (4H, E), (4H, H)
    b_ih, b_hh = params["b_ih"], params["b_hh"]          # (4H,), (4H,)
    w_fc, b_fc = params["w_fc"], params["b_fc"]          # (C, H), (C,)

    B, T = input_ids.shape
    E = emb_table.shape[1]
    H = w_hh.shape[1]
    C = w_fc.shape[0]

    LANE, SUBLANE = 128, 8

    # ---- pad batch to a sublane multiple and pick a batch tile ------------
    B_pad = ((B + SUBLANE - 1) // SUBLANE) * SUBLANE
    if batch_tile is None:
        # Large M for the serial recurrence matmul (MXU row occupancy), but
        # keep >= 2 batch tiles when possible so the "parallel" axis can shard
        # across both TensorCores on v7x.
        batch_tile = min(B_pad, 256)
        if B_pad >= 2 * SUBLANE:
            batch_tile = min(batch_tile, B_pad // 2)
    batch_tile = max(SUBLANE, min(batch_tile, B_pad))
    batch_tile = (batch_tile // SUBLANE) * SUBLANE
    while B_pad % batch_tile != 0:       # B_pad is a multiple of 8 -> terminates
        batch_tile -= SUBLANE
    nb = B_pad // batch_tile

    # ---- pad classes to a full lane (lane-dense output store) -------------
    C_pad = ((C + LANE - 1) // LANE) * LANE

    # ---- pick the time chunk (prefer a divisor of T -> no step masking) ---
    if time_chunk is None:
        time_chunk = _largest_divisor_leq(T, 32)
        if time_chunk < min(T, 8):       # only tiny divisors -> accept padding+mask
            time_chunk = min(T, 32)
    time_chunk = max(1, min(time_chunk, T))

    # ---- VMEM budget: shrink the chunk if needed, set the limit explicitly -
    # v7x has 64 MiB physical VMEM (32 MiB scoped default); v5e's scoped
    # default is only 16 MiB.  Keep the working set comfortably under 40 MiB
    # and raise the scoped limit ourselves.
    VMEM_BUDGET = 40 * (1 << 20)
    while (_vmem_estimate(batch_tile, time_chunk, E, H, C_pad) > VMEM_BUDGET
           and time_chunk > 1):
        time_chunk = max(1, time_chunk // 2)
    est = _vmem_estimate(batch_tile, time_chunk, E, H, C_pad)
    vmem_limit = int(min(64 * (1 << 20), max(32 * (1 << 20), int(1.5 * est))))

    # ---- pad time to a multiple of the chunk ------------------------------
    T_pad = ((T + time_chunk - 1) // time_chunk) * time_chunk
    nt = T_pad // time_chunk

    # ---- gather the embedding directly in the kernel's streaming layout ---
    # Rows inside batch-tile b are ordered (timestep-major, then batch), so the
    # kernel consumes each streamed slab without any transpose/reshape.
    ids = jnp.transpose(input_ids)                                   # (T, B)
    ids = jnp.pad(ids, ((0, T_pad - T), (0, B_pad - B)))             # (T_pad, B_pad)
    ids = ids.reshape(T_pad, nb, batch_tile).transpose(1, 0, 2)      # (nb, T_pad, Bt)
    ids = ids.reshape(nb, T_pad * batch_tile)
    emb = emb_table[ids].astype(matmul_dtype)                        # (nb, T_pad*Bt, E)

    # ---- weights: pre-transposed so every matmul is row-major x @ W --------
    wih_t = jnp.transpose(w_ih).astype(matmul_dtype)                 # (E, 4H)
    whh_t = jnp.transpose(w_hh).astype(matmul_dtype)                 # (H, 4H)
    bias = (b_ih + b_hh).reshape(1, 4 * H).astype(jnp.float32)       # (1, 4H)
    wfc_t = jnp.pad(jnp.transpose(w_fc),
                    ((0, 0), (0, C_pad - C))).astype(matmul_dtype)   # (H, C_pad)
    bfc = jnp.pad(b_fc.reshape(1, C),
                  ((0, 0), (0, C_pad - C))).astype(jnp.float32)      # (1, C_pad)

    kernel = functools.partial(lstm_chunk_kernel,
                               seq_len=T, time_chunk=time_chunk)

    logits_padded = pl.pallas_call(
        kernel,
        out_shape=jax.ShapeDtypeStruct((B_pad, C_pad), jnp.float32),
        grid=(nb, nt),
        in_specs=[
            # streamed per (batch-tile, time-chunk); double-buffered by Pallas
            pl.BlockSpec((None, time_chunk * batch_tile, E),
                         lambda b, t: (b, t, 0)),
            # weights/biases: constant index maps -> DMA'd once, stay resident
            pl.BlockSpec((E, 4 * H), lambda b, t: (0, 0)),
            pl.BlockSpec((H, 4 * H), lambda b, t: (0, 0)),
            pl.BlockSpec((1, 4 * H), lambda b, t: (0, 0)),
            pl.BlockSpec((H, C_pad), lambda b, t: (0, 0)),
            pl.BlockSpec((1, C_pad), lambda b, t: (0, 0)),
        ],
        out_specs=pl.BlockSpec((batch_tile, C_pad), lambda b, t: (b, 0)),
        scratch_shapes=[
            pltpu.VMEM((batch_tile, H), jnp.float32),                 # h carry
            pltpu.VMEM((batch_tile, H), jnp.float32),                 # c carry
            pltpu.VMEM((time_chunk * batch_tile, 4 * H), jnp.float32)  # staged gx
        ],
        compiler_params=pltpu.CompilerParams(
            dimension_semantics=("parallel", "arbitrary"),
            vmem_limit_bytes=vmem_limit),
    )(emb, wih_t, whh_t, bias, wfc_t, bfc)

    return logits_padded[:B, :C]


def _reference_forward(input_ids, params, *, matmul_dtype=jnp.float32):
    """Pure-JAX reference mirroring PyTorch LSTM math.

    With matmul_dtype=bf16 it quantizes the matmul operands exactly the way the
    kernel feeds the MXU (f32 accumulation / f32 gate math), so the comparison
    can be tight.
    """
    def q(a):
        return a.astype(matmul_dtype).astype(jnp.float32)

    emb = q(params["embedding"][input_ids])                 # (B, T, E)
    w_ih, w_hh = q(params["w_ih"]), q(params["w_hh"])
    w_fc = q(params["w_fc"])
    b = (params["b_ih"] + params["b_hh"]).astype(jnp.float32)
    B, T, _ = emb.shape
    H = params["w_hh"].shape[1]
    h = jnp.zeros((B, H), jnp.float32)
    c = jnp.zeros((B, H), jnp.float32)
    for t in range(T):
        gates = emb[:, t, :] @ w_ih.T + q(h) @ w_hh.T + b
        i_g = jax.nn.sigmoid(gates[:, 0 * H:1 * H])
        f_g = jax.nn.sigmoid(gates[:, 1 * H:2 * H])
        g_g = jnp.tanh(gates[:, 2 * H:3 * H])
        o_g = jax.nn.sigmoid(gates[:, 3 * H:4 * H])
        c = f_g * c + i_g * g_g
        h = o_g * jnp.tanh(c)
    return q(h) @ w_fc.T + params["b_fc"].astype(jnp.float32)


def _check(name, logits, input_ids, params):
    B, _ = input_ids.shape
    C = params["w_fc"].shape[0]
    ref_bf16 = _reference_forward(input_ids, params, matmul_dtype=jnp.bfloat16)
    ref_f32 = _reference_forward(input_ids, params)
    assert logits.shape == (B, C), f"{name}: bad shape {logits.shape}"
    # Tight check against a reference that feeds the matmuls bf16 exactly like
    # the kernel (f32 accumulation / f32 gate math everywhere).
    assert jnp.allclose(logits, ref_bf16, atol=2e-3, rtol=2e-3), \
        f"{name}: max |diff| vs bf16-aware ref = {jnp.max(jnp.abs(logits - ref_bf16))}"
    # Loose sanity check against the pure-f32 PyTorch-equivalent math.
    assert jnp.allclose(logits, ref_f32, atol=1e-1, rtol=1e-1), \
        f"{name}: max |diff| vs f32 ref = {jnp.max(jnp.abs(logits - ref_f32))}"


if __name__ == "__main__":
    # Small, deterministic problem sizes (H=128 is the module's default
    # rnn_hidden_size, so gate slices are lane-aligned).
    B, T = 16, 8         # batch, sequence length
    V, E = 64, 128       # vocab size, embedding dim
    H = 128              # rnn_hidden_size (module default)
    C = 4                # num_classes

    key = jax.random.PRNGKey(0)
    k_emb, k_ih, k_hh, k_bih, k_bhh, k_fcw, k_fcb, k_ids, k_ids2 = \
        jax.random.split(key, 9)

    params = {
        "embedding": jax.random.normal(k_emb, (V, E), jnp.float32),
        "w_ih": 0.1 * jax.random.normal(k_ih, (4 * H, E), jnp.float32),
        "w_hh": 0.1 * jax.random.normal(k_hh, (4 * H, H), jnp.float32),
        "b_ih": 0.1 * jax.random.normal(k_bih, (4 * H,), jnp.float32),
        "b_hh": 0.1 * jax.random.normal(k_bhh, (4 * H,), jnp.float32),
        "w_fc": 0.1 * jax.random.normal(k_fcw, (C, H), jnp.float32),
        "b_fc": 0.1 * jax.random.normal(k_fcb, (C,), jnp.float32),
    }

    input_ids = jax.random.randint(k_ids, (B, T), 0, V, dtype=jnp.int32)

    # (a) explicit tiny tiles -> grid (2, 2): exercises both the parallel
    #     batch-tile axis and the h/c carry across time chunks.
    fwd_a = jax.jit(functools.partial(skipgram_classifier_forward,
                                      time_chunk=4, batch_tile=8))
    logits_a = jax.block_until_ready(fwd_a(input_ids, params))
    _check("explicit tiles", logits_a, input_ids, params)

    # (b) auto-selected tiles (default heuristics: divisor time chunk, nb>=2).
    fwd_b = jax.jit(skipgram_classifier_forward)
    logits_b = jax.block_until_ready(fwd_b(input_ids, params))
    _check("auto tiles", logits_b, input_ids, params)

    # (c) ragged shapes: batch/time padding + final-chunk step masking.
    ids_ragged = jax.random.randint(k_ids2, (5, 7), 0, V, dtype=jnp.int32)
    fwd_c = jax.jit(functools.partial(skipgram_classifier_forward,
                                      time_chunk=4))
    logits_c = jax.block_until_ready(fwd_c(ids_ragged, params))
    _check("ragged", logits_c, ids_ragged, params)

    print("KERNEL_OK")
</pallas_src>

<mosaic_0001>
module attributes {stable_mosaic.version = 11 : i64} {
  func.func @lstm_chunk_kernel(%arg0: i32, %arg1: i32, %arg2: memref<1x32x128xbf16, #tpu.memory_space<vmem>>, %arg3: memref<128x512xbf16, #tpu.memory_space<vmem>>, %arg4: memref<128x512xbf16, #tpu.memory_space<vmem>>, %arg5: memref<1x512xf32, #tpu.memory_space<vmem>>, %arg6: memref<128x128xbf16, #tpu.memory_space<vmem>>, %arg7: memref<1x128xf32, #tpu.memory_space<vmem>>, %arg8: memref<8x128xf32, #tpu.memory_space<vmem>>, %arg9: memref<8x128xf32, #tpu.memory_space<vmem>>, %arg10: memref<8x128xf32, #tpu.memory_space<vmem>>, %arg11: memref<32x512xf32, #tpu.memory_space<vmem>>) attributes {dimension_semantics = [#tpu.dimension_semantics<parallel>, #tpu.dimension_semantics<arbitrary>], iteration_bounds = array<i64: 2, 2>, scalar_prefetch = 0 : i64, scratch_operands = 3 : i64, tpu.core_type = #tpu.core_type<tc>, window_params = [{transform_indices = @transform_0, window_bounds = array<i64: 1, 32, 128>}, {pipeline_mode = #tpu.pipeline_mode<synchronous>, transform_indices = @transform_1, window_bounds = array<i64: 128, 512>}, {pipeline_mode = #tpu.pipeline_mode<synchronous>, transform_indices = @transform_2, window_bounds = array<i64: 128, 512>}, {pipeline_mode = #tpu.pipeline_mode<synchronous>, transform_indices = @transform_3, window_bounds = array<i64: 1, 512>}, {pipeline_mode = #tpu.pipeline_mode<synchronous>, transform_indices = @transform_4, window_bounds = array<i64: 128, 128>}, {pipeline_mode = #tpu.pipeline_mode<synchronous>, transform_indices = @transform_5, window_bounds = array<i64: 1, 128>}, {transform_indices = @transform_6, window_bounds = array<i64: 8, 128>}]} {
    %c0_i32 = arith.constant 0 : i32
    %0 = arith.cmpi eq, %arg1, %c0_i32 : i32
    %1 = arith.extui %0 : i1 to i32
    %c0_i32_0 = arith.constant 0 : i32
    %2 = arith.cmpi ne, %1, %c0_i32_0 : i32
    scf.if %2 {
      %cst_41 = arith.constant 0.000000e+00 : f32
      %135 = vector.broadcast %cst_41 : f32 to vector<8x128xf32>
      %c0_42 = arith.constant 0 : index
      %c0_43 = arith.constant 0 : index
      %136 = vector.load %arg9[%c0_42, %c0_43] : memref<8x128xf32, #tpu.memory_space<vmem>>, vector<8x128xf32>
      tpu.vector_store %arg9[%c0_42, %c0_43], %135 {strides = array<i32>} : memref<8x128xf32, #tpu.memory_space<vmem>>, vector<8x128xf32>,
      %cst_44 = arith.constant 0.000000e+00 : f32
      %137 = vector.broadcast %cst_44 : f32 to vector<8x128xf32>
      %c0_45 = arith.constant 0 : index
      %c0_46 = arith.constant 0 : index
      %138 = vector.load %arg10[%c0_45, %c0_46] : memref<8x128xf32, #tpu.memory_space<vmem>>, vector<8x128xf32>
      tpu.vector_store %arg10[%c0_45, %c0_46], %137 {strides = array<i32>} : memref<8x128xf32, #tpu.memory_space<vmem>>, vector<8x128xf32>,
    } else {
    }
    %c0 = arith.constant 0 : index
    %c0_1 = arith.constant 0 : index
    %c0_2 = arith.constant 0 : index
    %3 = vector.load %arg2[%c0, %c0_1, %c0_2] : memref<1x32x128xbf16, #tpu.memory_space<vmem>>, vector<1x32x128xbf16>
    %4 = vector.shape_cast %3 : vector<1x32x128xbf16> to vector<32x128xbf16>
    %c0_3 = arith.constant 0 : index
    %c0_4 = arith.constant 0 : index
    %5 = vector.load %arg3[%c0_3, %c0_4] : memref<128x512xbf16, #tpu.memory_space<vmem>>, vector<128x512xbf16>
    %cst = arith.constant dense<0.000000e+00> : vector<32x512xf32>
    %6 = tpu.matmul %4, %5, %cst {dimension_numbers = #tpu.dot_dimension_numbers<[1], [0], [0], [1], [0, 0, 1, 1], [], []>} : vector<32x128xbf16>, vector<128x512xbf16>, vector<32x512xf32> -> vector<32x512xf32>
    %c0_5 = arith.constant 0 : index
    %c0_6 = arith.constant 0 : index
    %7 = vector.load %arg5[%c0_5, %c0_6] : memref<1x512xf32, #tpu.memory_space<vmem>>, vector<1x512xf32>
    %8 = vector.broadcast %7 : vector<1x512xf32> to vector<32x512xf32>
    %9 = arith.addf %6, %8 : vector<32x512xf32>
    %c0_7 = arith.constant 0 : index
    %c0_8 = arith.constant 0 : index
    %10 = vector.load %arg11[%c0_7, %c0_8] : memref<32x512xf32, #tpu.memory_space<vmem>>, vector<32x512xf32>
    tpu.vector_store %arg11[%c0_7, %c0_8], %9 {strides = array<i32>} : memref<32x512xf32, #tpu.memory_space<vmem>>, vector<32x512xf32>,
    %c0_9 = arith.constant 0 : index
    %c0_10 = arith.constant 0 : index
    %11 = vector.load %arg4[%c0_9, %c0_10] : memref<128x512xbf16, #tpu.memory_space<vmem>>, vector<128x512xbf16>
    %c0_11 = arith.constant 0 : index
    %c0_12 = arith.constant 0 : index
    %12 = vector.load %arg9[%c0_11, %c0_12] : memref<8x128xf32, #tpu.memory_space<vmem>>, vector<8x128xf32>
    %c0_13 = arith.constant 0 : index
    %c0_14 = arith.constant 0 : index
    %13 = vector.load %arg10[%c0_13, %c0_14] : memref<8x128xf32, #tpu.memory_space<vmem>>, vector<8x128xf32>
    %c0_15 = arith.constant 0 : index
    %c0_16 = arith.constant 0 : index
    %14 = vector.load %arg11[%c0_15, %c0_16] : memref<32x512xf32, #tpu.memory_space<vmem>>, vector<8x512xf32>
    %15 = arith.truncf %12 : vector<8x128xf32> to vector<8x128xbf16>
    %cst_17 = arith.constant dense<0.000000e+00> : vector<8x512xf32>
    %16 = tpu.matmul %15, %11, %cst_17 {dimension_numbers = #tpu.dot_dimension_numbers<[1], [0], [0], [1], [0, 0, 1, 1], [], []>} : vector<8x128xbf16>, vector<128x512xbf16>, vector<8x512xf32> -> vector<8x512xf32>
    %17 = arith.addf %14, %16 : vector<8x512xf32>
    %18 = vector.extract_strided_slice %17 {offsets = [0, 0], sizes = [8, 128], strides = [1, 1]} : vector<8x512xf32> to vector<8x128xf32>
    %19 = arith.negf %18 : vector<8x128xf32>
    %20 = math.exp %19 : vector<8x128xf32>
    %cst_18 = arith.constant 1.000000e+00 : f32
    %21 = vector.broadcast %cst_18 : f32 to vector<8x128xf32>
    %22 = arith.addf %21, %20 : vector<8x128xf32>
    %23 = arith.divf %21, %22 : vector<8x128xf32>
    %24 = vector.extract_strided_slice %17 {offsets = [0, 128], sizes = [8, 128], strides = [1, 1]} : vector<8x512xf32> to vector<8x128xf32>
    %25 = arith.negf %24 : vector<8x128xf32>
    %26 = math.exp %25 : vector<8x128xf32>
    %cst_19 = arith.constant 1.000000e+00 : f32
    %27 = vector.broadcast %cst_19 : f32 to vector<8x128xf32>
    %28 = arith.addf %27, %26 : vector<8x128xf32>
    %29 = arith.divf %27, %28 : vector<8x128xf32>
    %30 = vector.extract_strided_slice %17 {offsets = [0, 256], sizes = [8, 128], strides = [1, 1]} : vector<8x512xf32> to vector<8x128xf32>
    %31 = math.tanh %30 : vector<8x128xf32>
    %32 = vector.extract_strided_slice %17 {offsets = [0, 384], sizes = [8, 128], strides = [1, 1]} : vector<8x512xf32> to vector<8x128xf32>
    %33 = arith.negf %32 : vector<8x128xf32>
    %34 = math.exp %33 : vector<8x128xf32>
    %cst_20 = arith.constant 1.000000e+00 : f32
    %35 = vector.broadcast %cst_20 : f32 to vector<8x128xf32>
    %36 = arith.addf %35, %34 : vector<8x128xf32>
    %37 = arith.divf %35, %36 : vector<8x128xf32>
    %38 = arith.mulf %29, %13 : vector<8x128xf32>
    %39 = arith.mulf %23, %31 : vector<8x128xf32>
    %40 = arith.addf %38, %39 : vector<8x128xf32>
    %41 = math.tanh %40 : vector<8x128xf32>
    %42 = arith.mulf %37, %41 : vector<8x128xf32>
    %c8 = arith.constant 8 : index
    %c0_21 = arith.constant 0 : index
    %43 = vector.load %arg11[%c8, %c0_21] : memref<32x512xf32, #tpu.memory_space<vmem>>, vector<8x512xf32>
    %44 = arith.truncf %42 : vector<8x128xf32> to vector<8x128xbf16>
    %cst_22 = arith.constant dense<0.000000e+00> : vector<8x512xf32>
    %45 = tpu.matmul %44, %11, %cst_22 {dimension_numbers = #tpu.dot_dimension_numbers<[1], [0], [0], [1], [0, 0, 1, 1], [], []>} : vector<8x128xbf16>, vector<128x512xbf16>, vector<8x512xf32> -> vector<8x512xf32>
    %46 = arith.addf %43, %45 : vector<8x512xf32>
    %47 = vector.extract_strided_slice %46 {offsets = [0, 0], sizes = [8, 128], strides = [1, 1]} : vector<8x512xf32> to vector<8x128xf32>
    %48 = arith.negf %47 : vector<8x128xf32>
    %49 = math.exp %48 : vector<8x128xf32>
    %cst_23 = arith.constant 1.000000e+00 : f32
    %50 = vector.broadcast %cst_23 : f32 to vector<8x128xf32>
    %51 = arith.addf %50, %49 : vector<8x128xf32>
    %52 = arith.divf %50, %51 : vector<8x128xf32>
    %53 = vector.extract_strided_slice %46 {offsets = [0, 128], sizes = [8, 128], strides = [1, 1]} : vector<8x512xf32> to vector<8x128xf32>
    %54 = arith.negf %53 : vector<8x128xf32>
    %55 = math.exp %54 : vector<8x128xf32>
    %cst_24 = arith.constant 1.000000e+00 : f32
    %56 = vector.broadcast %cst_24 : f32 to vector<8x128xf32>
    %57 = arith.addf %56, %55 : vector<8x128xf32>
    %58 = arith.divf %56, %57 : vector<8x128xf32>
    %59 = vector.extract_strided_slice %46 {offsets = [0, 256], sizes = [8, 128], strides = [1, 1]} : vector<8x512xf32> to vector<8x128xf32>
    %60 = math.tanh %59 : vector<8x128xf32>
    %61 = vector.extract_strided_slice %46 {offsets = [0, 384], sizes = [8, 128], strides = [1, 1]} : vector<8x512xf32> to vector<8x128xf32>
    %62 = arith.negf %61 : vector<8x128xf32>
    %63 = math.exp %62 : vector<8x128xf32>
    %cst_25 = arith.constant 1.000000e+00 : f32
    %64 = vector.broadcast %cst_25 : f32 to vector<8x128xf32>
    %65 = arith.addf %64, %63 : vector<8x128xf32>
    %66 = arith.divf %64, %65 : vector<8x128xf32>
    %67 = arith.mulf %58, %40 : vector<8x128xf32>
    %68 = arith.mulf %52, %60 : vector<8x128xf32>
    %69 = arith.addf %67, %68 : vector<8x128xf32>
    %70 = math.tanh %69 : vector<8x128xf32>
    %71 = arith.mulf %66, %70 : vector<8x128xf32>
    %c16 = arith.constant 16 : index
    %c0_26 = arith.constant 0 : index
    %72 = vector.load %arg11[%c16, %c0_26] : memref<32x512xf32, #tpu.memory_space<vmem>>, vector<8x512xf32>
    %73 = arith.truncf %71 : vector<8x128xf32> to vector<8x128xbf16>
    %cst_27 = arith.constant dense<0.000000e+00> : vector<8x512xf32>
    %74 = tpu.matmul %73, %11, %cst_27 {dimension_numbers = #tpu.dot_dimension_numbers<[1], [0], [0], [1], [0, 0, 1, 1], [], []>} : vector<8x128xbf16>, vector<128x512xbf16>, vector<8x512xf32> -> vector<8x512xf32>
    %75 = arith.addf %72, %74 : vector<8x512xf32>
    %76 = vector.extract_strided_slice %75 {offsets = [0, 0], sizes = [8, 128], strides = [1, 1]} : vector<8x512xf32> to vector<8x128xf32>
    %77 = arith.negf %76 : vector<8x128xf32>
    %78 = math.exp %77 : vector<8x128xf32>
    %cst_28 = arith.constant 1.000000e+00 : f32
    %79 = vector.broadcast %cst_28 : f32 to vector<8x128xf32>
    %80 = arith.addf %79, %78 : vector<8x128xf32>
    %81 = arith.divf %79, %80 : vector<8x128xf32>
    %82 = vector.extract_strided_slice %75 {offsets = [0, 128], sizes = [8, 128], strides = [1, 1]} : vector<8x512xf32> to vector<8x128xf32>
    %83 = arith.negf %82 : vector<8x128xf32>
    %84 = math.exp %83 : vector<8x128xf32>
    %cst_29 = arith.constant 1.000000e+00 : f32
    %85 = vector.broadcast %cst_29 : f32 to vector<8x128xf32>
    %86 = arith.addf %85, %84 : vector<8x128xf32>
    %87 = arith.divf %85, %86 : vector<8x128xf32>
    %88 = vector.extract_strided_slice %75 {offsets = [0, 256], sizes = [8, 128], strides = [1, 1]} : vector<8x512xf32> to vector<8x128xf32>
    %89 = math.tanh %88 : vector<8x128xf32>
    %90 = vector.extract_strided_slice %75 {offsets = [0, 384], sizes = [8, 128], strides = [1, 1]} : vector<8x512xf32> to vector<8x128xf32>
    %91 = arith.negf %90 : vector<8x128xf32>
    %92 = math.exp %91 : vector<8x128xf32>
    %cst_30 = arith.constant 1.000000e+00 : f32
    %93 = vector.broadcast %cst_30 : f32 to vector<8x128xf32>
    %94 = arith.addf %93, %92 : vector<8x128xf32>
    %95 = arith.divf %93, %94 : vector<8x128xf32>
    %96 = arith.mulf %87, %69 : vector<8x128xf32>
    %97 = arith.mulf %81, %89 : vector<8x128xf32>
    %98 = arith.addf %96, %97 : vector<8x128xf32>
    %99 = math.tanh %98 : vector<8x128xf32>
    %100 = arith.mulf %95, %99 : vector<8x128xf32>
    %c24 = arith.constant 24 : index
    %c0_31 = arith.constant 0 : index
    %101 = vector.load %arg11[%c24, %c0_31] : memref<32x512xf32, #tpu.memory_space<vmem>>, vector<8x512xf32>
    %102 = arith.truncf %100 : vector<8x128xf32> to vector<8x128xbf16>
    %cst_32 = arith.constant dense<0.000000e+00> : vector<8x512xf32>
    %103 = tpu.matmul %102, %11, %cst_32 {dimension_numbers = #tpu.dot_dimension_numbers<[1], [0], [0], [1], [0, 0, 1, 1], [], []>} : vector<8x128xbf16>, vector<128x512xbf16>, vector<8x512xf32> -> vector<8x512xf32>
    %104 = arith.addf %101, %103 : vector<8x512xf32>
    %105 = vector.extract_strided_slice %104 {offsets = [0, 0], sizes = [8, 128], strides = [1, 1]} : vector<8x512xf32> to vector<8x128xf32>
    %106 = arith.negf %105 : vector<8x128xf32>
    %107 = math.exp %106 : vector<8x128xf32>
    %cst_33 = arith.constant 1.000000e+00 : f32
    %108 = vector.broadcast %cst_33 : f32 to vector<8x128xf32>
    %109 = arith.addf %108, %107 : vector<8x128xf32>
    %110 = arith.divf %108, %109 : vector<8x128xf32>
    %111 = vector.extract_strided_slice %104 {offsets = [0, 128], sizes = [8, 128], strides = [1, 1]} : vector<8x512xf32> to vector<8x128xf32>
    %112 = arith.negf %111 : vector<8x128xf32>
    %113 = math.exp %112 : vector<8x128xf32>
    %cst_34 = arith.constant 1.000000e+00 : f32
    %114 = vector.broadcast %cst_34 : f32 to vector<8x128xf32>
    %115 = arith.addf %114, %113 : vector<8x128xf32>
    %116 = arith.divf %114, %115 : vector<8x128xf32>
    %117 = vector.extract_strided_slice %104 {offsets = [0, 256], sizes = [8, 128], strides = [1, 1]} : vector<8x512xf32> to vector<8x128xf32>
    %118 = math.tanh %117 : vector<8x128xf32>
    %119 = vector.extract_strided_slice %104 {offsets = [0, 384], sizes = [8, 128], strides = [1, 1]} : vector<8x512xf32> to vector<8x128xf32>
    %120 = arith.negf %119 : vector<8x128xf32>
    %121 = math.exp %120 : vector<8x128xf32>
    %cst_35 = arith.constant 1.000000e+00 : f32
    %122 = vector.broadcast %cst_35 : f32 to vector<8x128xf32>
    %123 = arith.addf %122, %121 : vector<8x128xf32>
    %124 = arith.divf %122, %123 : vector<8x128xf32>
    %125 = arith.mulf %116, %98 : vector<8x128xf32>
    %126 = arith.mulf %110, %118 : vector<8x128xf32>
    %127 = arith.addf %125, %126 : vector<8x128xf32>
    %128 = math.tanh %127 : vector<8x128xf32>
    %129 = arith.mulf %124, %128 : vector<8x128xf32>
    %c0_36 = arith.constant 0 : index
    %c0_37 = arith.constant 0 : index
    %130 = vector.load %arg9[%c0_36, %c0_37] : memref<8x128xf32, #tpu.memory_space<vmem>>, vector<8x128xf32>
    tpu.vector_store %arg9[%c0_36, %c0_37], %129 {strides = array<i32>} : memref<8x128xf32, #tpu.memory_space<vmem>>, vector<8x128xf32>,
    %c0_38 = arith.constant 0 : index
    %c0_39 = arith.constant 0 : index
    %131 = vector.load %arg10[%c0_38, %c0_39] : memref<8x128xf32, #tpu.memory_space<vmem>>, vector<8x128xf32>
    tpu.vector_store %arg10[%c0_38, %c0_39], %127 {strides = array<i32>} : memref<8x128xf32, #tpu.memory_space<vmem>>, vector<8x128xf32>,
    %c1_i32 = arith.constant 1 : i32
    %132 = arith.cmpi eq, %arg1, %c1_i32 : i32
    %133 = arith.extui %132 : i1 to i32
    %c0_i32_40 = arith.constant 0 : i32
    %134 = arith.cmpi ne, %133, %c0_i32_40 : i32
    scf.if %134 {
      %135 = arith.truncf %129 : vector<8x128xf32> to vector<8x128xbf16>
      %c0_41 = arith.constant 0 : index
      %c0_42 = arith.constant 0 : index
      %136 = vector.load %arg6[%c0_41, %c0_42] : memref<128x128xbf16, #tpu.memory_space<vmem>>, vector<128x128xbf16>
      %cst_43 = arith.constant dense<0.000000e+00> : vector<8x128xf32>
      %137 = tpu.matmul %135, %136, %cst_43 {dimension_numbers = #tpu.dot_dimension_numbers<[1], [0], [0], [1], [0, 0, 1, 1], [], []>} : vector<8x128xbf16>, vector<128x128xbf16>, vector<8x128xf32> -> vector<8x128xf32>
      %c0_44 = arith.constant 0 : index
      %c0_45 = arith.constant 0 : index
      %138 = vector.load %arg7[%c0_44, %c0_45] : memref<1x128xf32, #tpu.memory_space<vmem>>, vector<1x128xf32>
      %139 = vector.broadcast %138 : vector<1x128xf32> to vector<8x128xf32>
      %140 = arith.addf %137, %139 : vector<8x128xf32>
      %c0_46 = arith.constant 0 : index
      %c0_47 = arith.constant 0 : index
      %141 = vector.load %arg8[%c0_46, %c0_47] : memref<8x128xf32, #tpu.memory_space<vmem>>, vector<8x128xf32>
      tpu.vector_store %arg8[%c0_46, %c0_47], %140 {strides = array<i32>} : memref<8x128xf32, #tpu.memory_space<vmem>>, vector<8x128xf32>,
    } else {
    }
    return
  }
  func.func @transform_0(%arg0: i32, %arg1: i32) -> (i32, i32, i32) {
    %c0_i32 = arith.constant 0 : i32
    %c0_i32_0 = arith.constant 0 : i32
    return %arg0, %arg1, %c0_i32 : i32, i32, i32
  }
  func.func @transform_1(%arg0: i32, %arg1: i32) -> (i32, i32) {
    %c0_i32 = arith.constant 0 : i32
    %c0_i32_0 = arith.constant 0 : i32
    %c0_i32_1 = arith.constant 0 : i32
    return %c0_i32, %c0_i32_0 : i32, i32
  }
  func.func @transform_2(%arg0: i32, %arg1: i32) -> (i32, i32) {
    %c0_i32 = arith.constant 0 : i32
    %c0_i32_0 = arith.constant 0 : i32
    %c0_i32_1 = arith.constant 0 : i32
    return %c0_i32, %c0_i32_0 : i32, i32
  }
  func.func @transform_3(%arg0: i32, %arg1: i32) -> (i32, i32) {
    %c0_i32 = arith.constant 0 : i32
    %c0_i32_0 = arith.constant 0 : i32
    %c0_i32_1 = arith.constant 0 : i32
    return %c0_i32, %c0_i32_0 : i32, i32
  }
  func.func @transform_4(%arg0: i32, %arg1: i32) -> (i32, i32) {
    %c0_i32 = arith.constant 0 : i32
    %c0_i32_0 = arith.constant 0 : i32
    %c0_i32_1 = arith.constant 0 : i32
    return %c0_i32, %c0_i32_0 : i32, i32
  }
  func.func @transform_5(%arg0: i32, %arg1: i32) -> (i32, i32) {
    %c0_i32 = arith.constant 0 : i32
    %c0_i32_0 = arith.constant 0 : i32
    %c0_i32_1 = arith.constant 0 : i32
    return %c0_i32, %c0_i32_0 : i32, i32
  }
  func.func @transform_6(%arg0: i32, %arg1: i32) -> (i32, i32) {
    %c0_i32 = arith.constant 0 : i32
    %c0_i32_0 = arith.constant 0 : i32
    return %arg0, %c0_i32 : i32, i32
  }
}

</mosaic_0001>

<bundles_post_ra>
// kernel: skipgram_classifier_forward.1
= control target key start
LH: loop header
LB: loop body
LE: loop exit
PB: predicated region body
PF: predicated region fallthrough
CT: control target
= control target key end

     0   :  { %s1902_s21 = smov 0   ;;  %s1904_s22 = smov 0   ;;  %s2435_s0 = inlined_call_operand.vmem [shape: bf16[2,64,128], index: 0, kind: input, shape index: {}]   ;;  %s2436_s1 = inlined_call_operand.vmem [shape: bf16[128,512], index: 1, kind: input, shape index: {}]   ;;  %s2437_s2 = inlined_call_operand.vmem [shape: bf16[128,512], index: 2, kind: input, shape index: {}]   ;;  %s2438_s3 = inlined_call_operand.vmem [shape: f32[1,512], index: 3, kind: input, shape index: {}]   ;;  %s2439_s4 = inlined_call_operand.vmem [shape: bf16[128,128], index: 4, kind: input, shape index: {}]   ;;  %s2440_s5 = inlined_call_operand.vmem [shape: f32[1,128], index: 5, kind: input, shape index: {}]   ;;  %s2441_s6 = inlined_call_operand.vmem [shape: f32[16,128], index: 6, kind: output, shape index: {}]  }
   0x1   :  { %s1906_s23 = smov 0   ;;  %s1908_s24 = smov 0  }
   0x2   :  { %s1910_s25 = smov 0  }
   0x3 LB: > { %s25_s26 = sadd.s32 1, %s1853_s23  ;;  %s28_s27 = sadd.s32 1, %s1857_s24  ;;  %s1861_s25 = sphi %s1910_s25, %s16_s25   ;;  %s1857_s24 = sphi %s1908_s24, %s2462_s24   ;;  %s1853_s23 = sphi %s1906_s23, %s2461_s23   ;;  %s1849_s22 = sphi %s1904_s22, %s2460_s22   ;;  %s1845_s21 = sphi %s1902_s21, %s2459_s21  }
   0x4   : > { %p26_p0 = scmp.ge.s32.totalorder %s25_s26, 2  ;;  %p1484_p1 = scmp.ge.s32.totalorder %s1861_s25, 1 }
   0x5   : > { %p231_p2 = scmp.lt.s32.totalorder %s1861_s25, 5 }
   0x6   : > { %s2464_s26 = smov (%p26_p0, %s25_s26), 0  ;;  %s2466_s27 = smov (!%p26_p0, %s28_s27), %s1857_s24 }
   0x7   : > { %p232_p3 = pnand %p1484_p1, %p231_p2  ;;  %p30_p4 = scmp.ge.s32.totalorder %s2466_s27, 2 }
   0x9   : > { %s2468_s27 = smov (%p30_p4, %s2466_s27), 0  ;;  %235 = sbr.rel (%p232_p3) target bundleno = 1349 (0x545), region = 44 }
  0x10   : > { %s1485_s28 = sshll.u32 %s1845_s21, 2  ;;  %p265_p5 = scmp.lt.s32.totalorder %s1849_s22, 1 }
  0x11   : > { %p267_p6 = scmp.lt.s32.totalorder %s1485_s28, 7  ;;  %p1489_p7 = scmp.ne.s32.totalorder %s1845_s21, 0 }
  0x12   : > { %s2470_s22 = smov (!%p265_p5, %s1849_s22), 1  ;;  %v1863_v0 = vmov (!%p1489_p7), 0.0  }
  0x13   : > { %s2472_s28 = smov (!%p267_p6, %s1485_s28), 7  ;;  %s1486_s29 = sshll.u32 %s2470_s22, 3  ;;  %283 = vst [vmem:[#allocation2] sm:$0xff] (!%p1489_p7), %v1863_v0  ;;  %284 = vst [vmem:[#allocation3] sm:$0xff] (!%p1489_p7), %v1863_v0 }
  0x14   : > { %s270_s30 = sadd.s32 %s1486_s29, %s2472_s28  ;;  %s1938_s9 = scalar_lea.vmem %s2441_s6, %s1486_s29 }
  0x15   : > { %s1487_s10 = sshll.u32 %s270_s30, 2  ;;  %282 = sbr.rel (%p1489_p7) target bundleno = 28 (0x1c), region = 48 }
  0x16   : > { %s1943_s13 = scalar_lea.vmem %s2435_s0, %s1487_s10 }
  0x1c PF: > { %v1653_v1 = vld [vmem:[%s2436_s1 + $0x4] ss:$16 sps:$4 sm:$0xff]   ;;  %v1655_v2 = vld [vmem:[%s2436_s1 + $0xc] ss:$16 sps:$4 sm:$0xff]   ;;  %v2442_v3 = vmov 0   ;;  %p1568_p8 = scmp.ne.s32.totalorder %s1845_s21, 1 }
  0x1d   : > { %547 = vmatprep.mubr.bf16.mxu0 %v2442_v3  ;;  %600 = vmatprep.mubr.bf16.mxu1 %v2442_v3  ;;  %v1657_v4 = vld [vmem:[%s2436_s1] ss:$16 sps:$4 sm:$0xff]   ;;  %v1658_v5 = vld [vmem:[%s2436_s1 + $0x8] ss:$16 sps:$4 sm:$0xff]   ;;  %v1659_v6 = vld [vmem:[%s2436_s1 + $0x24] ss:$16 sps:$4 sm:$0xff]  }
  0x1e   : > { %515 = vmatprep.subr.bf16.mxu0 %v1653_v1  ;;  %568 = vmatprep.subr.bf16.mxu1 %v1655_v2  ;;  %v1661_v7 = vld [vmem:[%s2436_s1 + $0x2c] ss:$16 sps:$4 sm:$0xff]   ;;  %v1663_v8 = vld [vmem:[%s2436_s1 + $0x20] ss:$16 sps:$4 sm:$0xff]   ;;  %v1664_v9 = vld [vmem:[%s2436_s1 + $0x28] ss:$16 sps:$4 sm:$0xff]  }
  0x1f   : > { %516 = vmatpush1.bf16.msra.mxu0 %v1657_v4  ;;  %569 = vmatpush1.bf16.msra.mxu1 %v1658_v5  ;;  %v1665_v10 = vld [vmem:[%s2436_s1 + $0x44] ss:$16 sps:$4 sm:$0xff]   ;;  %v1667_v11 = vld [vmem:[%s2436_s1 + $0x4c] ss:$16 sps:$4 sm:$0xff]   ;;  %v1669_v12 = vld [vmem:[%s2436_s1 + $0x40] ss:$16 sps:$4 sm:$0xff]  }
  0x20   : > { %517 = vmatprep.subr.bf16.mxu0 %v1659_v6  ;;  %570 = vmatprep.subr.bf16.mxu1 %v1661_v7  ;;  %v1670_v13 = vld [vmem:[%s2436_s1 + $0x48] ss:$16 sps:$4 sm:$0xff]   ;;  %v1671_v14 = vld [vmem:[%s2436_s1 + $0x64] ss:$16 sps:$4 sm:$0xff]   ;;  %v1673_v15 = vld [vmem:[%s2436_s1 + $0x6c] ss:$16 sps:$4 sm:$0xff]   ;;  %v323_v7 = vlaneseq }
  0x21   : > { %v1675_v16 = vld [vmem:[%s2436_s1 + $0x60] ss:$16 sps:$4 sm:$0xff]   ;;  %v1676_v17 = vld [vmem:[%s2436_s1 + $0x68] ss:$16 sps:$4 sm:$0xff]   ;;  %v1677_v18 = vld [vmem:[%s2436_s1 + $0x84] ss:$16 sps:$4 sm:$0xff]  }
  0x22   : > { %v1679_v19 = vld [vmem:[%s2436_s1 + $0x8c] ss:$16 sps:$4 sm:$0xff]   ;;  %v1681_v20 = vld [vmem:[%s2436_s1 + $0x80] ss:$16 sps:$4 sm:$0xff]   ;;  %v1682_v21 = vld [vmem:[%s2436_s1 + $0x88] ss:$16 sps:$4 sm:$0xff]  }
  0x23   : > { %518 = vmatpush1.bf16.msra.mxu0 %v1663_v8  ;;  %571 = vmatpush1.bf16.msra.mxu1 %v1664_v9  ;;  %v1683_v22 = vld [vmem:[%s2436_s1 + $0xa4] ss:$16 sps:$4 sm:$0xff]   ;;  %v1685_v23 = vld [vmem:[%s2436_s1 + $0xac] ss:$16 sps:$4 sm:$0xff]   ;;  %v1687_v24 = vld [vmem:[%s2436_s1 + $0xa0] ss:$16 sps:$4 sm:$0xff]  }
  0x24   : > { %519 = vmatprep.subr.bf16.mxu0 %v1665_v10  ;;  %572 = vmatprep.subr.bf16.mxu1 %v1667_v11  ;;  %v1688_v25 = vld [vmem:[%s2436_s1 + $0xa8] ss:$16 sps:$4 sm:$0xff]   ;;  %v1689_v26 = vld [vmem:[%s2436_s1 + $0xc4] ss:$16 sps:$4 sm:$0xff]   ;;  %v1691_v27 = vld [vmem:[%s2436_s1 + $0xcc] ss:$16 sps:$4 sm:$0xff]  }
  0x25   : > { %v1693_v28 = vld [vmem:[%s2436_s1 + $0xc0] ss:$16 sps:$4 sm:$0xff]   ;;  %v1694_v29 = vld [vmem:[%s2436_s1 + $0xc8] ss:$16 sps:$4 sm:$0xff]   ;;  %v1695_v30 = vld [vmem:[%s2436_s1 + $0xe4] ss:$16 sps:$4 sm:$0xff]  }
  0x26   : > { %v1697_v31 = vld [vmem:[%s2436_s1 + $0xec] ss:$16 sps:$4 sm:$0xff]   ;;  %v1699_v32 = vld [vmem:[%s2436_s1 + $0xe0] ss:$16 sps:$4 sm:$0xff]   ;;  %v1700_v33 = vld [vmem:[%s2436_s1 + $0xe8] ss:$16 sps:$4 sm:$0xff]  }
  0x27   : > { %520 = vmatpush1.bf16.msra.mxu0 %v1669_v12  ;;  %573 = vmatpush1.bf16.msra.mxu1 %v1670_v13  ;;  %v2047_v34 = vld [vmem:[%s2437_s2 + $0x4] ss:$16 sps:$4 sm:$0xff]   ;;  %v2052_v35 = vld [vmem:[%s2437_s2 + $0xc] ss:$16 sps:$4 sm:$0xff]   ;;  %v2058_v37 = vld [vmem:[%s2437_s2] ss:$16 sps:$4 sm:$0xff]  }
  0x28   : > { %521 = vmatprep.subr.bf16.mxu0 %v1671_v14  ;;  %574 = vmatprep.subr.bf16.mxu1 %v1673_v15  ;;  %v1701_v36 = vld [vmem:[%s1943_s13] sm:$0xff]   ;;  %v2063_v38 = vld [vmem:[%s2437_s2 + $0x8] ss:$16 sps:$4 sm:$0xff]   ;;  %v2075_v40 = vld [vmem:[%s2437_s2 + $0x2c] ss:$16 sps:$4 sm:$0xff]   ;;  %v324_v8 = vshrl.u32 %v323_v7, 7 }
  0x29   : > { %v2068_v39 = vld [vmem:[%s2437_s2 + $0x24] ss:$16 sps:$4 sm:$0xff]   ;;  %v2080_v41 = vld [vmem:[%s2437_s2 + $0x20] ss:$16 sps:$4 sm:$0xff]   ;;  %v2085_v42 = vld [vmem:[%s2437_s2 + $0x28] ss:$16 sps:$4 sm:$0xff]  }
  0x2a   : > { %v2092_v43 = vld [vmem:[%s2437_s2 + $0x44] ss:$16 sps:$4 sm:$0xff]   ;;  %v2099_v44 = vld [vmem:[%s2437_s2 + $0x4c] ss:$16 sps:$4 sm:$0xff]   ;;  %v2104_v45 = vld [vmem:[%s2437_s2 + $0x40] ss:$16 sps:$4 sm:$0xff]  }
  0x2b   : > { %522 = vmatpush1.bf16.msra.mxu0 %v1675_v16  ;;  %575 = vmatpush1.bf16.msra.mxu1 %v1676_v17  ;;  %v1736_v46 = vld [vmem:[%s1943_s13 + $0x8] sm:$0xff]   ;;  %v2121_v48 = vld [vmem:[%s2437_s2 + $0x64] ss:$16 sps:$4 sm:$0xff]   ;;  %v2133_v50 = vld [vmem:[%s2437_s2 + $0x60] ss:$16 sps:$4 sm:$0xff]   ;;  %v325_v9 = vsub.s32 0, %v324_v8 }
  0x2c   : > { %523 = vmatprep.subr.bf16.mxu0 %v1677_v18  ;;  %576 = vmatprep.subr.bf16.mxu1 %v1679_v19  ;;  %v2114_v47 = vld [vmem:[%s2437_s2 + $0x48] ss:$16 sps:$4 sm:$0xff]   ;;  %v2126_v49 = vld [vmem:[%s2437_s2 + $0x6c] ss:$16 sps:$4 sm:$0xff]   ;;  %v2145_v52 = vld [vmem:[%s2437_s2 + $0x84] ss:$16 sps:$4 sm:$0xff]  }
  0x2d   : > { %v2138_v51 = vld [vmem:[%s2437_s2 + $0x68] ss:$16 sps:$4 sm:$0xff]   ;;  %v2150_v53 = vld [vmem:[%s2437_s2 + $0x8c] ss:$16 sps:$4 sm:$0xff]   ;;  %v2159_v54 = vld [vmem:[%s2437_s2 + $0x80] ss:$16 sps:$4 sm:$0xff]  }
  0x2e   : > { %v2164_v55 = vld [vmem:[%s2437_s2 + $0x88] ss:$16 sps:$4 sm:$0xff]   ;;  %v2171_v56 = vld [vmem:[%s2437_s2 + $0xa4] ss:$16 sps:$4 sm:$0xff]   ;;  %v2176_v57 = vld [vmem:[%s2437_s2 + $0xac] ss:$16 sps:$4 sm:$0xff]  }
  0x2f   : > { %524 = vmatpush1.bf16.msra.mxu0 %v1681_v20  ;;  %577 = vmatpush1.bf16.msra.mxu1 %v1682_v21  ;;  %v2183_v58 = vld [vmem:[%s2437_s2 + $0xa0] ss:$16 sps:$4 sm:$0xff]   ;;  %v2188_v59 = vld [vmem:[%s2437_s2 + $0xa8] ss:$16 sps:$4 sm:$0xff]   ;;  %v2195_v60 = vld [vmem:[%s2437_s2 + $0xc4] ss:$16 sps:$4 sm:$0xff]  }
  0x30   : > { %525 = vmatprep.subr.bf16.mxu0 %v1683_v22  ;;  %578 = vmatprep.subr.bf16.mxu1 %v1685_v23  ;;  %v2200_v61 = vld [vmem:[%s2437_s2 + $0xcc] ss:$16 sps:$4 sm:$0xff]   ;;  %v2207_v62 = vld [vmem:[%s2437_s2 + $0xc0] ss:$16 sps:$4 sm:$0xff]   ;;  %v2212_v63 = vld [vmem:[%s2437_s2 + $0xc8] ss:$16 sps:$4 sm:$0xff]  }
  0x31   : > { %v2219_v0 = vld [vmem:[%s2437_s2 + $0xe4] ss:$16 sps:$4 sm:$0xff]   ;;  %v2224_v1 = vld [vmem:[%s2437_s2 + $0xec] ss:$16 sps:$4 sm:$0xff]   ;;  %v2231_v2 = vld [vmem:[%s2437_s2 + $0xe0] ss:$16 sps:$4 sm:$0xff]  }
  0x32   : > { %v2236_v4 = vld [vmem:[%s2437_s2 + $0xe8] ss:$16 sps:$4 sm:$0xff]   ;;  %v669_v5 = vld [vmem:[#allocation2] sm:$0xff]  ;;  %v333_v10 = vsub.s32 2, %v324_v8  ;;  %v337_v12 = vsub.s32 3, %v324_v8  ;;  %v329_v13 = vsub.s32 1, %v324_v8 }
  0x33   : > { %526 = vmatpush1.bf16.msra.mxu0 %v1687_v24  ;;  %579 = vmatpush1.bf16.msra.mxu1 %v1688_v25  ;;  %v675_v6 = vpack.c.bf16 %v669_v5, %v669_v5  ;;  %v321_v11 = vld [vmem:[%s2438_s3] sm:$0xf]  ;;  %vm1866_vm0 = vmmov (!%p1568_p8), 0  }
  0x34   : > { %527 = vmatprep.subr.bf16.mxu0 %v1689_v26  ;;  %580 = vmatprep.subr.bf16.mxu1 %v1691_v27  ;;  %v326_v14 = vrot.slane %v321_v11, %v325_v9  ;;  %v334_v15 = vrot.slane %v321_v11, %v333_v10  ;;  %v338_v18 = vrot.slane %v321_v11, %v337_v12 }
  0x35   : > { %v330_v21 = vrot.slane %v321_v11, %v329_v13 }
  0x37   : > { %528 = vmatpush1.bf16.msra.mxu0 %v1693_v28  ;;  %581 = vmatpush1.bf16.msra.mxu1 %v1694_v29 }
  0x38   : > { %529 = vmatprep.subr.bf16.mxu0 %v1695_v30  ;;  %582 = vmatprep.subr.bf16.mxu1 %v1697_v31 }
  0x3b   : > { %530 = vmatpush1.bf16.msra.mxu0 %v1699_v32  ;;  %583 = vmatpush1.bf16.msra.mxu1 %v1700_v33 }
  0x3c   : > { %836 = vmatprep.subr.bf16.mxu0 %v2047_v34  ;;  %877 = vmatprep.subr.bf16.mxu1 %v2052_v35 }
  0x3e   : > { %548 = vmatmul.mubr.bf16.vlgmr.msra.gmra.mrb[0].mxu0 %v1701_v36  ;;  %601 = vmatmul.mubr.bf16.vlgmr.msra.gmra.mrb[0].mxu1 %v1701_v36 }
  0x3f   : > { %837 = vmatpush1.bf16.msra.mxu0 %v2058_v37  ;;  %878 = vmatpush1.bf16.msra.mxu1 %v2063_v38 }
  0x40   : > { %838 = vmatprep.subr.bf16.mxu0 %v2068_v39  ;;  %879 = vmatprep.subr.bf16.mxu1 %v2075_v40 }
  0x41   : > { %557 = vmatprep.mubr.bf16.mxu0 %v2442_v3  ;;  %610 = vmatprep.mubr.bf16.mxu1 %v2442_v3 }
  0x43   : > { %839 = vmatpush1.bf16.msra.mxu0 %v2080_v41  ;;  %880 = vmatpush1.bf16.msra.mxu1 %v2085_v42 }
  0x44   : > { %840 = vmatprep.subr.bf16.mxu0 %v2092_v43  ;;  %881 = vmatprep.subr.bf16.mxu1 %v2099_v44 }
  0x46   : > { %558 = vmatmul.mubr.bf16.gmra.mrb[4].mxu0 %v1736_v46  ;;  %611 = vmatmul.mubr.bf16.gmra.mrb[4].mxu1 %v1736_v46 }
  0x47   : > { %841 = vmatpush1.bf16.msra.mxu0 %v2104_v45  ;;  %882 = vmatpush1.bf16.msra.mxu1 %v2114_v47 }
  0x48   : > { %842 = vmatprep.subr.bf16.mxu0 %v2121_v48  ;;  %883 = vmatprep.subr.bf16.mxu1 %v2126_v49 }
  0x49   : > { %868 = vmatprep.mubr.bf16.mxu0 %v2442_v3  ;;  %909 = vmatprep.mubr.bf16.mxu1 %v2442_v3 }
  0x4b   : > { %843 = vmatpush1.bf16.msra.mxu0 %v2133_v50  ;;  %884 = vmatpush1.bf16.msra.mxu1 %v2138_v51 }
  0x4c   : > { %844 = vmatprep.subr.bf16.mxu0 %v2145_v52  ;;  %885 = vmatprep.subr.bf16.mxu1 %v2150_v53 }
  0x4f   : > { %845 = vmatpush1.bf16.msra.mxu0 %v2159_v54  ;;  %886 = vmatpush1.bf16.msra.mxu1 %v2164_v55 }
  0x50   : > { %846 = vmatprep.subr.bf16.mxu0 %v2171_v56  ;;  %887 = vmatprep.subr.bf16.mxu1 %v2176_v57 }
  0x53   : > { %847 = vmatpush1.bf16.msra.mxu0 %v2183_v58  ;;  %888 = vmatpush1.bf16.msra.mxu1 %v2188_v59 }
  0x54   : > { %848 = vmatprep.subr.bf16.mxu0 %v2195_v60  ;;  %889 = vmatprep.subr.bf16.mxu1 %v2200_v61 }
  0x57   : > { %849 = vmatpush1.bf16.msra.mxu0 %v2207_v62  ;;  %890 = vmatpush1.bf16.msra.mxu1 %v2212_v63 }
  0x58   : > { %850 = vmatprep.subr.bf16.mxu0 %v2219_v0  ;;  %891 = vmatprep.subr.bf16.mxu1 %v2224_v1 }
  0x5b   : > { %851 = vmatpush1.bf16.msra.mxu0 %v2231_v2  ;;  %892 = vmatpush1.bf16.msra.mxu1 %v2236_v4 }
  0x5c   : > { %951 = vmatprep.subr.bf16.mxu0 %v2047_v34  ;;  %992 = vmatprep.subr.bf16.mxu1 %v2052_v35 }
  0x5e   : > { %869 = vmatmul.mubr.bf16.vlgmr.msra.gmra.mrb[8].mxu0 %v675_v6  ;;  %910 = vmatmul.mubr.bf16.vlgmr.msra.gmra.mrb[8].mxu1 %v675_v6 }
  0x5f   : > { %952 = vmatpush1.bf16.msra.mxu0 %v2058_v37  ;;  %993 = vmatpush1.bf16.msra.mxu1 %v2063_v38 }
  0x60   : > { %953 = vmatprep.subr.bf16.mxu0 %v2068_v39  ;;  %994 = vmatprep.subr.bf16.mxu1 %v2075_v40 }
  0x61   : > { %983 = vmatprep.mubr.bf16.mxu0 %v2442_v3  ;;  %1024 = vmatprep.mubr.bf16.mxu1 %v2442_v3 }
  0x63   : > { %954 = vmatpush1.bf16.msra.mxu0 %v2080_v41  ;;  %995 = vmatpush1.bf16.msra.mxu1 %v2085_v42 }
  0x64   : > { %955 = vmatprep.subr.bf16.mxu0 %v2092_v43  ;;  %996 = vmatprep.subr.bf16.mxu1 %v2099_v44 }
  0x67   : > { %956 = vmatpush1.bf16.msra.mxu0 %v2104_v45  ;;  %997 = vmatpush1.bf16.msra.mxu1 %v2114_v47 }
  0x68   : > { %957 = vmatprep.subr.bf16.mxu0 %v2121_v48  ;;  %998 = vmatprep.subr.bf16.mxu1 %v2126_v49 }
  0x6b   : > { %958 = vmatpush1.bf16.msra.mxu0 %v2133_v50  ;;  %999 = vmatpush1.bf16.msra.mxu1 %v2138_v51 }
  0x6c   : > { %959 = vmatprep.subr.bf16.mxu0 %v2145_v52  ;;  %1000 = vmatprep.subr.bf16.mxu1 %v2150_v53 }
  0x6f   : > { %960 = vmatpush1.bf16.msra.mxu0 %v2159_v54  ;;  %1001 = vmatpush1.bf16.msra.mxu1 %v2164_v55 }
  0x70   : > { %961 = vmatprep.subr.bf16.mxu0 %v2171_v56  ;;  %1002 = vmatprep.subr.bf16.mxu1 %v2176_v57 }
  0x73   : > { %962 = vmatpush1.bf16.msra.mxu0 %v2183_v58  ;;  %1003 = vmatpush1.bf16.msra.mxu1 %v2188_v59 }
  0x74   : > { %963 = vmatprep.subr.bf16.mxu0 %v2195_v60  ;;  %1004 = vmatprep.subr.bf16.mxu1 %v2200_v61 }
  0x77   : > { %964 = vmatpush1.bf16.msra.mxu0 %v2207_v62  ;;  %1005 = vmatpush1.bf16.msra.mxu1 %v2212_v63 }
  0x78   : > { %965 = vmatprep.subr.bf16.mxu0 %v2219_v0  ;;  %1006 = vmatprep.subr.bf16.mxu1 %v2224_v1 }
  0x7b   : > { %966 = vmatpush1.bf16.msra.mxu0 %v2231_v2  ;;  %1007 = vmatpush1.bf16.msra.mxu1 %v2236_v4 }
  0x7c   : > { %1066 = vmatprep.subr.bf16.mxu0 %v2047_v34  ;;  %1107 = vmatprep.subr.bf16.mxu1 %v2052_v35 }
 0x111   : > { %v549_v16 = vpop.f32.mrb[0].mxu0  ;;  %v602_v17 = vpop.f32.mrb[0].mxu1 }
 0x112   : > { %v551_v19 = vpop.f32.mrb[1].mxu0  ;;  %v604_v20 = vpop.f32.mrb[1].mxu1 }
 0x113   : > { %v553_v22 = vpop.f32.mrb[2].mxu0  ;;  %v606_v23 = vpop.f32.mrb[2].mxu1 }
 0x114   : > { %v2281_v24 = vadd.f32 %v553_v22, %v326_v14  ;;  %v555_v25 = vpop.f32.mrb[3].mxu0  ;;  %v2283_v26 = vadd.f32 %v606_v23, %v334_v15  ;;  %v608_v27 = vpop.f32.mrb[3].mxu1  ;;  %v550_v23 = vadd.f32 %v549_v16, %v326_v14 }
 0x115   : > { %v2285_v28 = vadd.f32 %v555_v25, %v330_v21  ;;  %v2287_v29 = vadd.f32 %v608_v27, %v338_v18  ;;  %v603_v25 = vadd.f32 %v602_v17, %v334_v15  ;;  %v552_v27 = vadd.f32 %v551_v19, %v330_v21 }
 0x119   : > { %v559_v30 = vpop.f32.mrb[4].mxu0  ;;  %v612_v31 = vpop.f32.mrb[4].mxu1 }
 0x11a   : > { %v2289_v32 = vadd.f32 %v559_v30, %v326_v14  ;;  %v561_v33 = vpop.f32.mrb[5].mxu0  ;;  %v2291_v36 = vadd.f32 %v612_v31, %v334_v15  ;;  %v614_v46 = vpop.f32.mrb[5].mxu1  ;;  %v605_v30 = vadd.f32 %v604_v20, %v338_v18 }
 0x11b   : > { %v2293_v5 = vadd.f32 %v561_v33, %v330_v21  ;;  %v563_v6 = vpop.f32.mrb[6].mxu0  ;;  %v2295_v7 = vadd.f32 %v614_v46, %v338_v18  ;;  %v616_v8 = vpop.f32.mrb[6].mxu1 }
 0x11c   : > { %2444 = vst [vmem:[#allocation5_spill] sm:$0xff] %v2289_v32  ;;  %2445 = vst [vmem:[#allocation6_spill] sm:$0xff] %v2291_v36  ;;  %v2297_v9 = vadd.f32 %v563_v6, %v326_v14  ;;  %v565_v10 = vpop.f32.mrb[7].mxu0  ;;  %v2299_v11 = vadd.f32 %v616_v8, %v334_v15  ;;  %v618_v12 = vpop.f32.mrb[7].mxu1 }
 0x11d   : > { %2446 = vst [vmem:[#allocation7_spill] sm:$0xff] %v2293_v5  ;;  %2447 = vst [vmem:[#allocation8_spill] sm:$0xff] %v2295_v7  ;;  %v2301_v13 = vadd.f32 %v565_v10, %v330_v21  ;;  %v2303_v22 = vadd.f32 %v618_v12, %v338_v18  ;;  %v670_v21 = vld [vmem:[#allocation3] sm:$0xff] }
 0x11e   : > { %2448 = vst [vmem:[#allocation9_spill] sm:$0xff] %v2297_v9  ;;  %2449 = vst [vmem:[#allocation10_spill] sm:$0xff] %v2299_v11 }
 0x11f   : > { %2450 = vst [vmem:[#allocation11_spill] sm:$0xff] %v2301_v13 }
 0x131   : > { %v870_v31 = vpop.f32.mrb[8].mxu0  ;;  %v911_v33 = vpop.f32.mrb[8].mxu1 }
 0x132   : > { %v918_v3 = vadd.f32 %v870_v31, %v550_v23  ;;  %v920_v46 = vadd.f32 %v911_v33, %v603_v25  ;;  %v872_v7 = vpop.f32.mrb[9].mxu0  ;;  %v913_v5 = vpop.f32.mrb[9].mxu1  ;;  %v2451_v25 = vmov 0  }
 0x133   : > { %v919_v6 = vadd.f32 %v872_v7, %v552_v27  ;;  %v921_v9 = vadd.f32 %v913_v5, %v605_v30  ;;  %v874_v36 = vpop.f32.mrb[10].mxu0  ;;  %v915_v8 = vpop.f32.mrb[10].mxu1 }
 0x134   : > { %v1556_v11 = vmul.f32 -1.442695, %v918_v3  ;;  %v875_v32 = vpop.f32.mrb[11].mxu0  ;;  %v916_v10 = vpop.f32.mrb[11].mxu1 }
 0x135   : > { %v1557_v13 = vmul.f32 -1.442695, %v919_v6  ;;  %v1558_v14 = vmul.f32 -1.442695, %v921_v9 }
 0x136   : > { %1751 = vpow2.f32 %v1556_v11 }
 0x137   : > { %1753 = vpow2.f32 %v1557_v13 }
 0x138   : > { %1755 = vpow2.f32 %v1558_v14 }
 0x139   : > { %1757 = vtanh.f32 %v920_v46 }
 0x140   : > { %v1752_v15 = vpop.eup %1751 }
 0x141   : > { %v1754_v16 = vpop.eup %1753  ;;  %v925_v17 = vadd.f32 1.0, %v1752_v15 }
 0x142   : > { %v931_v18 = vadd.f32 1.0, %v1754_v16  ;;  %v1756_v19 = vpop.eup %1755 }
 0x143   : > { %1759 = vrcp.f32 %v925_v17  ;;  %v1758_v20 = vpop.eup %1757  ;;  %v938_v32 = vadd.f32 1.0, %v1756_v19 }
 0x144   : > { %1761 = vrcp.f32 %v931_v18 }
 0x145   : > { %1763 = vrcp.f32 %v938_v32 }
 0x14d   : > { %v1760_v36 = vpop.eup %1759 }
 0x14e   : > { %v1762_v5 = vpop.eup %1761  ;;  %v942_v3 = vmul.f32 %v1760_v36, %v1758_v20 }
 0x14f   : > { %v941_v7 = vmul.f32 %v1762_v5, %v670_v21  ;;  %v1764_v9 = vpop.eup %1763 }
 0x151   : > { %v2305_v12 = vadd.f32 %v942_v3, %v941_v7 }
 0x153   : > { %1765 = vtanh.f32 %v2305_v12 }
 0x15d   : > { %v1766_v11 = vpop.eup %1765 }
 0x15e   : > { %v945_v13 = vmul.f32 %v1766_v11, %v1764_v9 }
 0x160   : > { %v950_v23 = vpack.c.bf16 %v945_v13, %v945_v13 }
 0x162   : > { %984 = vmatmul.mubr.bf16.vlgmr.msra.gmra.mrb[12].mxu0 %v950_v23  ;;  %1025 = vmatmul.mubr.bf16.vlgmr.msra.gmra.mrb[12].mxu1 %v950_v23 }
 0x163   : > { %1067 = vmatpush1.bf16.msra.mxu0 %v2058_v37  ;;  %1108 = vmatpush1.bf16.msra.mxu1 %v2063_v38 }
 0x164   : > { %1068 = vmatprep.subr.bf16.mxu0 %v2068_v39  ;;  %1109 = vmatprep.subr.bf16.mxu1 %v2075_v40 }
 0x165   : > { %1098 = vmatprep.mubr.bf16.mxu0 %v2451_v25  ;;  %1139 = vmatprep.mubr.bf16.mxu1 %v2451_v25 }
 0x167   : > { %1069 = vmatpush1.bf16.msra.mxu0 %v2080_v41  ;;  %1110 = vmatpush1.bf16.msra.mxu1 %v2085_v42 }
 0x168   : > { %1070 = vmatprep.subr.bf16.mxu0 %v2092_v43  ;;  %1111 = vmatprep.subr.bf16.mxu1 %v2099_v44 }
 0x16b   : > { %1071 = vmatpush1.bf16.msra.mxu0 %v2104_v45  ;;  %1112 = vmatpush1.bf16.msra.mxu1 %v2114_v47 }
 0x16c   : > { %1072 = vmatprep.subr.bf16.mxu0 %v2121_v48  ;;  %1113 = vmatprep.subr.bf16.mxu1 %v2126_v49 }
 0x16f   : > { %1073 = vmatpush1.bf16.msra.mxu0 %v2133_v50  ;;  %1114 = vmatpush1.bf16.msra.mxu1 %v2138_v51 }
 0x170   : > { %1074 = vmatprep.subr.bf16.mxu0 %v2145_v52  ;;  %1115 = vmatprep.subr.bf16.mxu1 %v2150_v53 }
 0x173   : > { %1075 = vmatpush1.bf16.msra.mxu0 %v2159_v54  ;;  %1116 = vmatpush1.bf16.msra.mxu1 %v2164_v55 }
 0x174   : > { %1076 = vmatprep.subr.bf16.mxu0 %v2171_v56  ;;  %1117 = vmatprep.subr.bf16.mxu1 %v2176_v57 }
 0x177   : > { %1077 = vmatpush1.bf16.msra.mxu0 %v2183_v58  ;;  %1118 = vmatpush1.bf16.msra.mxu1 %v2188_v59 }
 0x178   : > { %1078 = vmatprep.subr.bf16.mxu0 %v2195_v60  ;;  %1119 = vmatprep.subr.bf16.mxu1 %v2200_v61 }
 0x17b   : > { %1079 = vmatpush1.bf16.msra.mxu0 %v2207_v62  ;;  %1120 = vmatpush1.bf16.msra.mxu1 %v2212_v63 }
 0x17c   : > { %1080 = vmatprep.subr.bf16.mxu0 %v2219_v0  ;;  %1121 = vmatprep.subr.bf16.mxu1 %v2224_v1 }
 0x17f   : > { %1081 = vmatpush1.bf16.msra.mxu0 %v2231_v2  ;;  %1122 = vmatpush1.bf16.msra.mxu1 %v2236_v4 }
 0x180   : > { %1181 = vmatprep.subr.bf16.mxu0 %v2047_v34  ;;  %1222 = vmatprep.subr.bf16.mxu1 %v2052_v35 }
 0x235   : > { %v985_v27 = vpop.f32.mrb[12].mxu0  ;;  %v1026_v30 = vpop.f32.mrb[12].mxu1 }
 0x236   : > { %v1033_v31 = vadd.f32 %v985_v27, %v2281_v24  ;;  %v1035_v33 = vadd.f32 %v1026_v30, %v2283_v26  ;;  %v987_v46 = vpop.f32.mrb[13].mxu0  ;;  %v1028_v6 = vpop.f32.mrb[13].mxu1 }
 0x237   : > { %v1034_v8 = vadd.f32 %v987_v46, %v2285_v28  ;;  %v1036_v10 = vadd.f32 %v1028_v6, %v2287_v29  ;;  %v989_v14 = vpop.f32.mrb[14].mxu0  ;;  %v1030_v15 = vpop.f32.mrb[14].mxu1  ;;  %v2456_v6 = vld [vmem:[#allocation9_spill] sm:$0xff] }
 0x238   : > { %v1559_v16 = vmul.f32 -1.442695, %v1033_v31  ;;  %v990_v17 = vpop.f32.mrb[15].mxu0  ;;  %v1031_v18 = vpop.f32.mrb[15].mxu1 }
 0x239   : > { %v1560_v34 = vmul.f32 -1.442695, %v1034_v8  ;;  %v1561_v35 = vmul.f32 -1.442695, %v1036_v10  ;;  %v2457_v10 = vld [vmem:[#allocation10_spill] sm:$0xff]  ;;  %v2458_v17 = vld [vmem:[#allocation11_spill] sm:$0xff] }
 0x23a   : > { %1767 = vpow2.f32 %v1559_v16 }
 0x23b   : > { %1769 = vpow2.f32 %v1560_v34 }
 0x23c   : > { %1771 = vpow2.f32 %v1561_v35 }
 0x23d   : > { %1773 = vtanh.f32 %v1035_v33 }
 0x244   : > { %v1768_v19 = vpop.eup %1767 }
 0x245   : > { %v1770_v20 = vpop.eup %1769  ;;  %v1040_v24 = vadd.f32 1.0, %v1768_v19 }
 0x246   : > { %v1046_v26 = vadd.f32 1.0, %v1770_v20  ;;  %v1772_v28 = vpop.eup %1771 }
 0x247   : > { %1775 = vrcp.f32 %v1040_v24  ;;  %v1774_v21 = vpop.eup %1773  ;;  %v1053_v3 = vadd.f32 1.0, %v1772_v28 }
 0x248   : > { %1777 = vrcp.f32 %v1046_v26 }
 0x249   : > { %1779 = vrcp.f32 %v1053_v3 }
 0x251   : > { %v1776_v29 = vpop.eup %1775 }
 0x252   : > { %v1778_v36 = vpop.eup %1777  ;;  %v1057_v5 = vmul.f32 %v1776_v29, %v1774_v21 }
 0x253   : > { %v1056_v32 = vmul.f32 %v1778_v36, %v2305_v12  ;;  %v1780_v9 = vpop.eup %1779 }
 0x255   : > { %v2347_v7 = vadd.f32 %v1057_v5, %v1056_v32 }
 0x257   : > { %1781 = vtanh.f32 %v2347_v7 }
 0x261   : > { %v1782_v11 = vpop.eup %1781 }
 0x262   : > { %v1060_v13 = vmul.f32 %v1782_v11, %v1780_v9 }
 0x264   : > { %v1065_v23 = vpack.c.bf16 %v1060_v13, %v1060_v13 }
 0x266   : > { %1099 = vmatmul.mubr.bf16.vlgmr.msra.gmra.mrb[16].mxu0 %v1065_v23  ;;  %1140 = vmatmul.mubr.bf16.vlgmr.msra.gmra.mrb[16].mxu1 %v1065_v23 }
 0x267   : > { %1182 = vmatpush1.bf16.msra.mxu0 %v2058_v37  ;;  %1223 = vmatpush1.bf16.msra.mxu1 %v2063_v38 }
 0x268   : > { %1183 = vmatprep.subr.bf16.mxu0 %v2068_v39  ;;  %1224 = vmatprep.subr.bf16.mxu1 %v2075_v40  ;;  %v2452_v39 = vld [vmem:[#allocation5_spill] sm:$0xff] }
 0x269   : > { %1213 = vmatprep.mubr.bf16.mxu0 %v2451_v25  ;;  %1254 = vmatprep.mubr.bf16.mxu1 %v2451_v25 }
 0x26b   : > { %1184 = vmatpush1.bf16.msra.mxu0 %v2080_v41  ;;  %1225 = vmatpush1.bf16.msra.mxu1 %v2085_v42  ;;  %v2453_v41 = vld [vmem:[#allocation6_spill] sm:$0xff] }
 0x26c   : > { %1185 = vmatprep.subr.bf16.mxu0 %v2092_v43  ;;  %1226 = vmatprep.subr.bf16.mxu1 %v2099_v44 }
 0x26f   : > { %1186 = vmatpush1.bf16.msra.mxu0 %v2104_v45  ;;  %1227 = vmatpush1.bf16.msra.mxu1 %v2114_v47  ;;  %v2454_v45 = vld [vmem:[#allocation7_spill] sm:$0xff] }
 0x270   : > { %1187 = vmatprep.subr.bf16.mxu0 %v2121_v48  ;;  %1228 = vmatprep.subr.bf16.mxu1 %v2126_v49  ;;  %v2455_v48 = vld [vmem:[#allocation8_spill] sm:$0xff] }
 0x273   : > { %1188 = vmatpush1.bf16.msra.mxu0 %v2133_v50  ;;  %1229 = vmatpush1.bf16.msra.mxu1 %v2138_v51 }
 0x274   : > { %1189 = vmatprep.subr.bf16.mxu0 %v2145_v52  ;;  %1230 = vmatprep.subr.bf16.mxu1 %v2150_v53 }
 0x277   : > { %1190 = vmatpush1.bf16.msra.mxu0 %v2159_v54  ;;  %1231 = vmatpush1.bf16.msra.mxu1 %v2164_v55 }
 0x278   : > { %1191 = vmatprep.subr.bf16.mxu0 %v2171_v56  ;;  %1232 = vmatprep.subr.bf16.mxu1 %v2176_v57 }
 0x27b   : > { %1192 = vmatpush1.bf16.msra.mxu0 %v2183_v58  ;;  %1233 = vmatpush1.bf16.msra.mxu1 %v2188_v59 }
 0x27c   : > { %1193 = vmatprep.subr.bf16.mxu0 %v2195_v60  ;;  %1234 = vmatprep.subr.bf16.mxu1 %v2200_v61 }
 0x27f   : > { %1194 = vmatpush1.bf16.msra.mxu0 %v2207_v62  ;;  %1235 = vmatpush1.bf16.msra.mxu1 %v2212_v63 }
 0x280   : > { %1195 = vmatprep.subr.bf16.mxu0 %v2219_v0  ;;  %1236 = vmatprep.subr.bf16.mxu1 %v2224_v1 }
 0x283   : > { %1196 = vmatpush1.bf16.msra.mxu0 %v2231_v2  ;;  %1237 = vmatpush1.bf16.msra.mxu1 %v2236_v4 }
 0x339   : > { %v1100_v37 = vpop.f32.mrb[16].mxu0  ;;  %v1141_v38 = vpop.f32.mrb[16].mxu1 }
 0x33a   : > { %v1148_v40 = vadd.f32 %v1100_v37, %v2452_v39  ;;  %v1150_v42 = vadd.f32 %v1141_v38, %v2453_v41  ;;  %v1102_v43 = vpop.f32.mrb[17].mxu0  ;;  %v1143_v44 = vpop.f32.mrb[17].mxu1  ;;  %v1815_v41 = vld [vmem:[%s2439_s4] sm:$0xff] (!%p1568_p8)  }
 0x33b   : > { %v1149_v47 = vadd.f32 %v1102_v43, %v2454_v45  ;;  %v1151_v49 = vadd.f32 %v1143_v44, %v2455_v48  ;;  %v1104_v50 = vpop.f32.mrb[18].mxu0  ;;  %v1145_v51 = vpop.f32.mrb[18].mxu1  ;;  %v1816_v43 = vld [vmem:[%s2439_s4 + $0x8] sm:$0xff] (!%p1568_p8)   ;;  %v1817_v44 = vld [vmem:[%s2439_s4 + $0x10] sm:$0xff] (!%p1568_p8)   ;;  %v1818_v45 = vld [vmem:[%s2439_s4 + $0x18] sm:$0xff] (!%p1568_p8)  }
 0x33c   : > { %v1562_v52 = vmul.f32 -1.442695, %v1148_v40  ;;  %v1105_v53 = vpop.f32.mrb[19].mxu0  ;;  %v1146_v54 = vpop.f32.mrb[19].mxu1  ;;  %v1820_v48 = vld [vmem:[%s2439_s4 + $0x28] sm:$0xff] (!%p1568_p8)   ;;  %v1822_v50 = vld [vmem:[%s2439_s4 + $0x38] sm:$0xff] (!%p1568_p8)  }
 0x33d   : > { %v1563_v55 = vmul.f32 -1.442695, %v1149_v47  ;;  %v1564_v56 = vmul.f32 -1.442695, %v1151_v49  ;;  %v1819_v47 = vld [vmem:[%s2439_s4 + $0x20] sm:$0xff] (!%p1568_p8)   ;;  %v1821_v49 = vld [vmem:[%s2439_s4 + $0x30] sm:$0xff] (!%p1568_p8)  }
 0x33e   : > { %1783 = vpow2.f32 %v1562_v52  ;;  %v1569_v52 = vld [vmem:[%s2440_s5] ss:$0 sm:$0xff] (!%p1568_p8) }
 0x33f   : > { %1785 = vpow2.f32 %v1563_v55 }
 0x340   : > { %1787 = vpow2.f32 %v1564_v56 }
 0x341   : > { %1789 = vtanh.f32 %v1150_v42  ;;  %v1865_v42 = vmov (!%p1568_p8), 0.0  }
 0x342   : > { %1589 = vmatprep.subr.bf16.mxu0 (!%p1568_p8), %v1865_v42 }
 0x348   : > { %v1784_v57 = vpop.eup %1783 }
 0x349   : > { %v1786_v58 = vpop.eup %1785  ;;  %v1155_v59 = vadd.f32 1.0, %v1784_v57 }
 0x34a   : > { %v1161_v60 = vadd.f32 1.0, %v1786_v58  ;;  %v1788_v61 = vpop.eup %1787 }
 0x34b   : > { %1791 = vrcp.f32 %v1155_v59  ;;  %v1790_v62 = vpop.eup %1789  ;;  %v1168_v2 = vadd.f32 1.0, %v1788_v61 }
 0x34c   : > { %1793 = vrcp.f32 %v1161_v60 }
 0x34d   : > { %1795 = vrcp.f32 %v1168_v2 }
 0x355   : > { %v1792_v63 = vpop.eup %1791 }
 0x356   : > { %v1794_v0 = vpop.eup %1793  ;;  %v1172_v1 = vmul.f32 %v1792_v63, %v1790_v62 }
 0x357   : > { %v1171_v4 = vmul.f32 %v1794_v0, %v2347_v7  ;;  %v1796_v25 = vpop.eup %1795 }
 0x359   : > { %v1173_v12 = vadd.f32 %v1172_v1, %v1171_v4 }
 0x35b   : > { %1797 = vtanh.f32 %v1173_v12 }
 0x365   : > { %v1798_v27 = vpop.eup %1797 }
 0x366   : > { %v1175_v30 = vmul.f32 %v1798_v27, %v1796_v25 }
 0x368   : > { %v1180_v31 = vpack.c.bf16 %v1175_v30, %v1175_v30 }
 0x36a   : > { %1214 = vmatmul.mubr.bf16.vlgmr.msra.gmra.mrb[20].mxu0 %v1180_v31  ;;  %1255 = vmatmul.mubr.bf16.vlgmr.msra.gmra.mrb[20].mxu1 %v1180_v31 }
 0x36b   : > { %1590 = vmatpush3.bf16.msra.mxu0 (!%p1568_p8), %v1815_v41  ;;  %1605 = vmatprep.mubr.msk.bf16.mxu0 (!%p1568_p8), %vm1866_vm0, %v1865_v42 }
 0x36c   : > { %1591 = vmatprep.subr.bf16.mxu0 (!%p1568_p8), %v1865_v42 }
 0x36f   : > { %1592 = vmatpush3.bf16.msra.mxu0 (!%p1568_p8), %v1816_v43 }
 0x370   : > { %1593 = vmatprep.subr.bf16.mxu0 (!%p1568_p8), %v1865_v42 }
 0x373   : > { %1594 = vmatpush3.bf16.msra.mxu0 (!%p1568_p8), %v1817_v44 }
 0x374   : > { %1595 = vmatprep.subr.bf16.mxu0 (!%p1568_p8), %v1865_v42 }
 0x377   : > { %1596 = vmatpush3.bf16.msra.mxu0 (!%p1568_p8), %v1818_v45 }
 0x378   : > { %1597 = vmatprep.subr.bf16.mxu0 (!%p1568_p8), %v1865_v42 }
 0x37b   : > { %1598 = vmatpush3.bf16.msra.mxu0 (!%p1568_p8), %v1819_v47 }
 0x37c   : > { %1599 = vmatprep.subr.bf16.mxu0 (!%p1568_p8), %v1865_v42 }
 0x37f   : > { %1600 = vmatpush3.bf16.msra.mxu0 (!%p1568_p8), %v1820_v48 }
 0x380   : > { %1601 = vmatprep.subr.bf16.mxu0 (!%p1568_p8), %v1865_v42 }
 0x383   : > { %1602 = vmatpush3.bf16.msra.mxu0 (!%p1568_p8), %v1821_v49 }
 0x384   : > { %1603 = vmatprep.subr.bf16.mxu0 (!%p1568_p8), %v1865_v42 }
 0x387   : > { %1604 = vmatpush3.bf16.msra.mxu0 (!%p1568_p8), %v1822_v50 }
 0x43d   : > { %v1215_v33 = vpop.f32.mrb[20].mxu0  ;;  %v1256_v46 = vpop.f32.mrb[20].mxu1 }
 0x43e   : > { %v1263_v8 = vadd.f32 %v1215_v33, %v2456_v6  ;;  %v1265_v14 = vadd.f32 %v1256_v46, %v2457_v10  ;;  %v1217_v15 = vpop.f32.mrb[21].mxu0  ;;  %v1258_v16 = vpop.f32.mrb[21].mxu1 }
 0x43f   : > { %v1264_v18 = vadd.f32 %v1217_v15, %v2458_v17  ;;  %v1266_v34 = vadd.f32 %v1258_v16, %v2303_v22  ;;  %v1219_v35 = vpop.f32.mrb[22].mxu0  ;;  %v1260_v19 = vpop.f32.mrb[22].mxu1 }
 0x440   : > { %v1565_v20 = vmul.f32 -1.442695, %v1263_v8  ;;  %v1220_v24 = vpop.f32.mrb[23].mxu0  ;;  %v1261_v26 = vpop.f32.mrb[23].mxu1 }
 0x441   : > { %v1566_v28 = vmul.f32 -1.442695, %v1264_v18  ;;  %v1567_v21 = vmul.f32 -1.442695, %v1266_v34 }
 0x442   : > { %1799 = vpow2.f32 %v1565_v20 }
 0x443   : > { %1801 = vpow2.f32 %v1566_v28 }
 0x444   : > { %1803 = vpow2.f32 %v1567_v21 }
 0x445   : > { %1805 = vtanh.f32 %v1265_v14 }
 0x44c   : > { %v1800_v29 = vpop.eup %1799 }
 0x44d   : > { %v1802_v36 = vpop.eup %1801  ;;  %v1270_v5 = vadd.f32 1.0, %v1800_v29 }
 0x44e   : > { %v1276_v3 = vadd.f32 1.0, %v1802_v36  ;;  %v1804_v32 = vpop.eup %1803 }
 0x44f   : > { %1807 = vrcp.f32 %v1270_v5  ;;  %v1806_v7 = vpop.eup %1805  ;;  %v1283_v13 = vadd.f32 1.0, %v1804_v32 }
 0x450   : > { %1809 = vrcp.f32 %v1276_v3 }
 0x451   : > { %1811 = vrcp.f32 %v1283_v13 }
 0x459   : > { %v1808_v22 = vpop.eup %1807 }
 0x45a   : > { %v1810_v9 = vpop.eup %1809  ;;  %v1287_v11 = vmul.f32 %v1808_v22, %v1806_v7 }
 0x45b   : > { %v1286_v23 = vmul.f32 %v1810_v9, %v1173_v12  ;;  %v1812_v38 = vpop.eup %1811 }
 0x45d   : > { %v1288_v37 = vadd.f32 %v1287_v11, %v1286_v23 }
 0x45f   : > { %1813 = vtanh.f32 %v1288_v37  ;;  %1292 = vst [vmem:[#allocation3] sm:$0xff] %v1288_v37 }
 0x466   : > { %1296 = sbr.rel (%p1568_p8) target bundleno = 1349 (0x545), region = 52 }
 0x469   : > { %v1814_v39 = vpop.eup %1813 }
 0x46a   : > { %v1290_v40 = vmul.f32 %v1814_v39, %v1812_v38 }
 0x46c   : > { %1291 = vst [vmem:[#allocation2] sm:$0xff] %v1290_v40  ;;  %v1297_v51 = vpack.c.bf16 (!%p1568_p8), %v1290_v40, %v1290_v40 }
 0x46e   : > { %1606 = vmatmul.mubr.bf16.vlgmr.msra.gmra.mrb[0].mxu0 %v1297_v51 }
 0x541   : > { %v1403_v53 = vpop.f32.mrb[0].mxu0 }
 0x542   : > { %v1404_v54 = vadd.f32 %v1569_v52, %v1403_v53  ;;  %v1607_v55 = vpop.f32.mrb[1].mxu0 }
 0x543   : > { %v1406_v56 = vpop.f32.mrb[2].mxu0 }
 0x544   : > { %1409 = vst [vmem:[%s1938_s9] sm:$0xff] %v1404_v54  ;;  %v1608_v57 = vpop.f32.mrb[3].mxu0 }
 0x545 PF: > { %s16_s25 = sadd.s32 1, %s1861_s25   ;;  %s2459_s21 = smov %s1853_s23 }
 0x546   : > { %p13_p9 = scmp.ge.s32.totalorder %s16_s25, 6   ;;  %s2460_s22 = smov %s1857_s24 }
 0x547   : > { %s2461_s23 = smov %s2464_s26  ;;  %s2462_s24 = smov %s2468_s27 }
 0x548   :  { %15 = sbr.rel (!%p13_p9) target bundleno = 3 (0x3), region = 82 }

</bundles_post_ra>
